<compile_context>
chip_gen: v5e
topology: v5e:2x2
jax: 0.10.0
libtpu: 0.0.40
codegen_flags: <defaults>
</compile_context>

<pallas_src>
import functools

import jax
import jax.numpy as jnp
from jax.experimental import pallas as pl
from jax.experimental.pallas import tpu as pltpu

_MIB = 1024 * 1024


def _round_up(n, m):
    return ((n + m - 1) // m) * m


def _vmem_budget():
    """Generation-aware usable-VMEM budget in bytes."""
    try:
        cap = int(getattr(pltpu.get_tpu_info(), "vmem_capacity_bytes", 0)) or 128 * _MIB
    except Exception:
        cap = 128 * _MIB
    # Leave headroom for compiler-internal scratch; never claim > ~80% physical.
    # 64-MiB parts (v7x): ~51 MiB.  128-MiB parts (v5e/v6e): ~102 MiB.
    return min(int(cap * 0.8), cap - 12 * _MIB)


def _footprint(tm, tp, H, num_p, bpe):
    """Conservative VMEM bytes for one kernel configuration."""
    fp = 2 * tm * H * bpe                            # x rows (double-buffered)
    fp += 2 * tm * H * bpe                           # output rows (double-buffered)
    fp += 2 * (H * tp + tp * H + tp + H) * bpe       # W1 / W2 / b1 / b2 buffers
    fp += tm * tp * 4 + tm * tp * bpe                # f32 intermediate h + dtype copy
    if num_p > 1:
        fp += tm * H * 4                             # f32 accumulator scratch
    fp += 2 * _MIB                                   # compiler-internal scratch headroom
    return fp


def _tp_candidates(P128):
    """pf-slab widths: multiples of 128 that exactly divide the padded pf dim."""
    q = P128 // 128
    return sorted({128 * d for d in range(1, q + 1) if q % d == 0}, reverse=True)


def _choose_tiles(M, H, P128, bpe, budget, tm_req=None, tp_req=None):
    pack = max(8, 32 // bpe)                 # sublane pack: f32 8, bf16 16, int8/fp8 32
    small_vmem = budget < 60 * _MIB          # v7x-class part (64 MiB physical)
    tm_target = tm_req if tm_req is not None else (512 if small_vmem else 1024)
    tm = max(pack, _round_up(min(tm_target, M), pack))

    cands = _tp_candidates(P128)
    if tp_req is not None:
        tp_req = min(_round_up(tp_req, 128), P128)
        snapped = [c for c in cands if c <= tp_req]
        cands = snapped if snapped else [cands[-1]]

    while True:
        for tp in cands:                      # prefer the widest slab (fewest acc RMWs)
            num_p = P128 // tp
            if _footprint(tm, tp, H, num_p, bpe) <= budget:
                return tm, tp, num_p
        if tm <= pack:                        # last resort: smallest legal tiles
            tp = cands[-1]
            return tm, tp, P128 // tp
        tm = max(pack, _round_up(tm // 2, pack))


@functools.lru_cache(maxsize=None)
def _supports_buffered():
    if not hasattr(pl, "Buffered"):
        return False
    try:
        pl.BlockSpec((8, 128), lambda i: (0, 0), pipeline_mode=pl.Buffered(1))
        return True
    except (TypeError, ValueError):
        return False


# ----------------------------------------------------------------------------- kernels
def _ffn_kernel_fused(x_ref, w1_ref, b1_ref, w2_ref, b2_ref, o_ref):
    """Whole pf dim resident (num_p == 1): no accumulator, single pass, direct store."""
    h = jnp.dot(x_ref[...], w1_ref[...], preferred_element_type=jnp.float32)
    h = jnp.maximum(h + b1_ref[...].astype(jnp.float32), 0.0)
    # Dropout: eval-mode identity.  TODO(synk): training-mode dropout.
    h = h.astype(w2_ref.dtype)                       # bf16 MXU path for bf16 models
    out = jnp.dot(h, w2_ref[...], preferred_element_type=jnp.float32)
    o_ref[...] = (out + b2_ref[...].astype(jnp.float32)).astype(o_ref.dtype)


def _ffn_kernel_acc(x_ref, w1_ref, b1_ref, w2_ref, b2_ref, o_ref, acc_ref):
    """pf dim streamed in tp-wide slabs, reduced into an f32 VMEM accumulator."""
    p = pl.program_id(1)

    @pl.when(p == 0)
    def _init():
        acc_ref[...] = jnp.zeros_like(acc_ref)

    h = jnp.dot(x_ref[...], w1_ref[...], preferred_element_type=jnp.float32)
    h = jnp.maximum(h + b1_ref[...].astype(jnp.float32), 0.0)
    # Dropout: eval-mode identity.  TODO(synk): training-mode dropout.
    h = h.astype(w2_ref.dtype)
    acc_ref[...] += jnp.dot(h, w2_ref[...], preferred_element_type=jnp.float32)

    @pl.when(p == pl.num_programs(1) - 1)
    def _finalize():
        o_ref[...] = (acc_ref[...] + b2_ref[...].astype(jnp.float32)).astype(o_ref.dtype)


# ----------------------------------------------------------------------------- wrapper
def positionwise_feedforward(x, w1, b1, w2, b2, *, tm=None, tp=None,
                             vmem_limit_bytes=None):
    """Eval-mode PositionwiseFeedforward: relu(x @ W1 + b1) @ W2 + b2.

    x: [B, S, hid]; w1: [hid, pf]; b1: [pf]; w2: [pf, hid]; b2: [hid]
    (Conv1d(k=1) weights map as W = conv.weight.squeeze(-1).T.)
    """
    B, S, H = x.shape
    P = w1.shape[1]
    assert w1.shape == (H, P) and w2.shape == (P, H)
    assert b1.shape == (P,) and b2.shape == (H,)

    M = B * S
    x2d = x.reshape(M, H)                    # contiguous reshape: no data movement
    bpe = jnp.dtype(x.dtype).itemsize

    # pf padded to a lane multiple (tiny, weights only; pads contribute exactly 0).
    P128 = _round_up(P, 128)
    if P128 != P:
        w1 = jnp.pad(w1, ((0, 0), (0, P128 - P)))
        w2 = jnp.pad(w2, ((0, P128 - P), (0, 0)))
        b1 = jnp.pad(b1, (0, P128 - P))
    b1r = b1.reshape(1, P128)
    b2r = b2.reshape(1, H)

    budget = _vmem_budget()
    tm_, tp_, num_p = _choose_tiles(M, H, P128, bpe, budget, tm, tp)
    grid_m = pl.cdiv(M, tm_)                 # ragged last row tile: no host-side pad/slice

    need = _footprint(tm_, tp_, H, num_p, bpe)
    if vmem_limit_bytes is None:
        vmem_limit_bytes = min(max(int(need * 1.4), 32 * _MIB), budget)

    out_shape = jax.ShapeDtypeStruct((M, H), x.dtype)
    args = (x2d, w1, b1r, w2, b2r)

    if num_p == 1:
        def build(buffered):
            if buffered:
                wspec = lambda shp, im: pl.BlockSpec(shp, im, pipeline_mode=pl.Buffered(1))
            else:
                wspec = pl.BlockSpec
            return pl.pallas_call(
                _ffn_kernel_fused,
                out_shape=out_shape,
                grid_spec=pltpu.PrefetchScalarGridSpec(
                    num_scalar_prefetch=0,
                    grid=(grid_m,),
                    in_specs=[
                        pl.BlockSpec((tm_, H), lambda i: (i, 0)),   # x rows
                        wspec((H, P128), lambda i: (0, 0)),         # W1 (grid-constant)
                        wspec((1, P128), lambda i: (0, 0)),         # b1
                        wspec((P128, H), lambda i: (0, 0)),         # W2
                        wspec((1, H),    lambda i: (0, 0)),         # b2
                    ],
                    out_specs=pl.BlockSpec((tm_, H), lambda i: (i, 0)),
                ),
                compiler_params=pltpu.CompilerParams(
                    dimension_semantics=("parallel",),
                    vmem_limit_bytes=vmem_limit_bytes,
                ),
            )

        if _supports_buffered():
            try:
                out2d = build(True)(*args)
            except Exception:
                # Only the pipeline_mode differs below; the fallback uses strictly
                # MORE VMEM and identical numerics, so any genuine failure (OOM,
                # shape/lowering bug) reproduces and re-raises here un-masked.
                out2d = build(False)(*args)
        else:
            out2d = build(False)(*args)
    else:
        # pf streamed in tp-wide slabs; reduction axis last in the grid.
        # (If a trace shows exposed W-slab DMA at row-tile boundaries, try
        #  pipeline_mode=pl.Buffered(3) on the W1/W2 specs.)
        out2d = pl.pallas_call(
            _ffn_kernel_acc,
            out_shape=out_shape,
            grid_spec=pltpu.PrefetchScalarGridSpec(
                num_scalar_prefetch=0,
                grid=(grid_m, num_p),
                in_specs=[
                    pl.BlockSpec((tm_, H), lambda i, p: (i, 0)),    # x rows
                    pl.BlockSpec((H, tp_), lambda i, p: (0, p)),    # W1 slab
                    pl.BlockSpec((1, tp_), lambda i, p: (0, p)),    # b1 slab
                    pl.BlockSpec((tp_, H), lambda i, p: (p, 0)),    # W2 slab
                    pl.BlockSpec((1, H),   lambda i, p: (0, 0)),    # b2
                ],
                out_specs=pl.BlockSpec((tm_, H), lambda i, p: (i, 0)),
                scratch_shapes=[pltpu.VMEM((tm_, H), jnp.float32)],
            ),
            compiler_params=pltpu.CompilerParams(
                dimension_semantics=("parallel", "arbitrary"),
                vmem_limit_bytes=vmem_limit_bytes,
            ),
        )(*args)

    return out2d.reshape(B, S, H)


if __name__ == "__main__":
    # Module hyper-params (small, consistent with the forward pass).
    B, S, HID, PF = 2, 8, 32, 64

    key = jax.random.PRNGKey(0)
    kx, kw1, kb1, kw2, kb2 = jax.random.split(key, 5)

    x = jax.random.normal(kx, (B, S, HID), dtype=jnp.float32)
    # Conv1d(hid, pf, 1) params: weight [pf, hid, 1], bias [pf].
    # Stored pre-transposed for matmul: W1 = weight.squeeze(-1).T -> [hid, pf].
    w1 = jax.random.normal(kw1, (HID, PF), dtype=jnp.float32) * (1.0 / HID) ** 0.5
    b1 = jax.random.normal(kb1, (PF,), dtype=jnp.float32) * 0.01
    w2 = jax.random.normal(kw2, (PF, HID), dtype=jnp.float32) * (1.0 / PF) ** 0.5
    b2 = jax.random.normal(kb2, (HID,), dtype=jnp.float32) * 0.01

    # Reference: relu(x@W1+b1)@W2+b2 (same math as the PyTorch module, eval mode).
    ref = jnp.maximum(x @ w1 + b1, 0.0) @ w2 + b2

    # 1) f32 model, fused (num_p == 1) path.
    out = jax.block_until_ready(positionwise_feedforward(x, w1, b1, w2, b2))
    assert out.shape == (B, S, HID)
    assert jnp.allclose(out, ref, atol=1e-4, rtol=1e-4), \
        float(jnp.max(jnp.abs(out - ref)))

    # 2) bf16 model dtype: operands flow straight into the MXU, f32 accumulate only.
    xb = x.astype(jnp.bfloat16)
    w1b, b1b = w1.astype(jnp.bfloat16), b1.astype(jnp.bfloat16)
    w2b, b2b = w2.astype(jnp.bfloat16), b2.astype(jnp.bfloat16)
    out_bf16 = jax.block_until_ready(
        positionwise_feedforward(xb, w1b, b1b, w2b, b2b))
    assert out_bf16.shape == (B, S, HID) and out_bf16.dtype == jnp.bfloat16
    assert float(jnp.max(jnp.abs(out_bf16.astype(jnp.float32) - ref))) < 0.1

    # 3) Streaming-pf path (num_p > 1, f32 accumulator) + ragged rows (M % tm != 0).
    S2, PF2 = 9, 256
    x3 = jax.random.normal(kx, (B, S2, HID), dtype=jnp.float32)
    w13 = jax.random.normal(kw1, (HID, PF2), dtype=jnp.float32) * (1.0 / HID) ** 0.5
    b13 = jax.random.normal(kb1, (PF2,), dtype=jnp.float32) * 0.01
    w23 = jax.random.normal(kw2, (PF2, HID), dtype=jnp.float32) * (1.0 / PF2) ** 0.5
    b23 = jax.random.normal(kb2, (HID,), dtype=jnp.float32) * 0.01
    ref3 = jnp.maximum(x3 @ w13 + b13, 0.0) @ w23 + b23
    out3 = jax.block_until_ready(
        positionwise_feedforward(x3, w13, b13, w23, b23, tm=16, tp=128))
    assert out3.shape == (B, S2, HID)
    assert jnp.allclose(out3, ref3, atol=5e-4, rtol=5e-4), \
        float(jnp.max(jnp.abs(out3 - ref3)))

    print("KERNEL_OK")
</pallas_src>

<mosaic_0001>
module attributes {stable_mosaic.version = 11 : i64} {
  func.func @_ffn_kernel_fused(%arg0: i32, %arg1: memref<16x32xf32, #tpu.memory_space<vmem>>, %arg2: memref<32x128xf32, #tpu.memory_space<vmem>>, %arg3: memref<1x128xf32, #tpu.memory_space<vmem>>, %arg4: memref<128x32xf32, #tpu.memory_space<vmem>>, %arg5: memref<1x32xf32, #tpu.memory_space<vmem>>, %arg6: memref<16x32xf32, #tpu.memory_space<vmem>>) attributes {dimension_semantics = [#tpu.dimension_semantics<parallel>], iteration_bounds = array<i64: 1>, scalar_prefetch = 0 : i64, scratch_operands = 0 : i64, tpu.core_type = #tpu.core_type<tc>, window_params = [{transform_indices = @transform_0, window_bounds = array<i64: 16, 32>}, {pipeline_mode = #tpu.pipeline_mode<synchronous>, transform_indices = @transform_1, window_bounds = array<i64: 32, 128>}, {pipeline_mode = #tpu.pipeline_mode<synchronous>, transform_indices = @transform_2, window_bounds = array<i64: 1, 128>}, {pipeline_mode = #tpu.pipeline_mode<synchronous>, transform_indices = @transform_3, window_bounds = array<i64: 128, 32>}, {pipeline_mode = #tpu.pipeline_mode<synchronous>, transform_indices = @transform_4, window_bounds = array<i64: 1, 32>}, {transform_indices = @transform_5, window_bounds = array<i64: 16, 32>}]} {
    %c0 = arith.constant 0 : index
    %c0_0 = arith.constant 0 : index
    %0 = vector.load %arg1[%c0, %c0_0] : memref<16x32xf32, #tpu.memory_space<vmem>>, vector<16x32xf32>
    %c0_1 = arith.constant 0 : index
    %c0_2 = arith.constant 0 : index
    %1 = vector.load %arg2[%c0_1, %c0_2] : memref<32x128xf32, #tpu.memory_space<vmem>>, vector<32x128xf32>
    %cst = arith.constant dense<0.000000e+00> : vector<16x128xf32>
    %2 = tpu.matmul %0, %1, %cst {dimension_numbers = #tpu.dot_dimension_numbers<[1], [0], [0], [1], [0, 0, 1, 1], [], []>} : vector<16x32xf32>, vector<32x128xf32>, vector<16x128xf32> -> vector<16x128xf32>
    %c0_3 = arith.constant 0 : index
    %c0_4 = arith.constant 0 : index
    %3 = vector.load %arg3[%c0_3, %c0_4] : memref<1x128xf32, #tpu.memory_space<vmem>>, vector<1x128xf32>
    %4 = vector.broadcast %3 : vector<1x128xf32> to vector<16x128xf32>
    %5 = arith.addf %2, %4 : vector<16x128xf32>
    %cst_5 = arith.constant 0.000000e+00 : f32
    %6 = vector.broadcast %cst_5 : f32 to vector<16x128xf32>
    %7 = arith.maximumf %5, %6 : vector<16x128xf32>
    %c0_6 = arith.constant 0 : index
    %c0_7 = arith.constant 0 : index
    %8 = vector.load %arg4[%c0_6, %c0_7] : memref<128x32xf32, #tpu.memory_space<vmem>>, vector<128x32xf32>
    %cst_8 = arith.constant dense<0.000000e+00> : vector<16x32xf32>
    %9 = tpu.matmul %7, %8, %cst_8 {dimension_numbers = #tpu.dot_dimension_numbers<[1], [0], [0], [1], [0, 0, 1, 1], [], []>} : vector<16x128xf32>, vector<128x32xf32>, vector<16x32xf32> -> vector<16x32xf32>
    %c0_9 = arith.constant 0 : index
    %c0_10 = arith.constant 0 : index
    %10 = vector.load %arg5[%c0_9, %c0_10] : memref<1x32xf32, #tpu.memory_space<vmem>>, vector<1x32xf32>
    %11 = vector.broadcast %10 : vector<1x32xf32> to vector<16x32xf32>
    %12 = arith.addf %9, %11 : vector<16x32xf32>
    %c0_11 = arith.constant 0 : index
    %c0_12 = arith.constant 0 : index
    %13 = vector.load %arg6[%c0_11, %c0_12] : memref<16x32xf32, #tpu.memory_space<vmem>>, vector<16x32xf32>
    tpu.vector_store %arg6[%c0_11, %c0_12], %12 {strides = array<i32>} : memref<16x32xf32, #tpu.memory_space<vmem>>, vector<16x32xf32>,
    return
  }
  func.func @transform_0(%arg0: i32) -> (i32, i32) {
    %c0_i32 = arith.constant 0 : i32
    %c0_i32_0 = arith.constant 0 : i32
    return %arg0, %c0_i32 : i32, i32
  }
  func.func @transform_1(%arg0: i32) -> (i32, i32) {
    %c0_i32 = arith.constant 0 : i32
    %c0_i32_0 = arith.constant 0 : i32
    %c0_i32_1 = arith.constant 0 : i32
    return %c0_i32, %c0_i32_0 : i32, i32
  }
  func.func @transform_2(%arg0: i32) -> (i32, i32) {
    %c0_i32 = arith.constant 0 : i32
    %c0_i32_0 = arith.constant 0 : i32
    %c0_i32_1 = arith.constant 0 : i32
    return %c0_i32, %c0_i32_0 : i32, i32
  }
  func.func @transform_3(%arg0: i32) -> (i32, i32) {
    %c0_i32 = arith.constant 0 : i32
    %c0_i32_0 = arith.constant 0 : i32
    %c0_i32_1 = arith.constant 0 : i32
    return %c0_i32, %c0_i32_0 : i32, i32
  }
  func.func @transform_4(%arg0: i32) -> (i32, i32) {
    %c0_i32 = arith.constant 0 : i32
    %c0_i32_0 = arith.constant 0 : i32
    %c0_i32_1 = arith.constant 0 : i32
    return %c0_i32, %c0_i32_0 : i32, i32
  }
  func.func @transform_5(%arg0: i32) -> (i32, i32) {
    %c0_i32 = arith.constant 0 : i32
    %c0_i32_0 = arith.constant 0 : i32
    return %arg0, %c0_i32 : i32, i32
  }
}

module attributes {stable_mosaic.version = 11 : i64} {
  func.func @_ffn_kernel_fused(%arg0: i32, %arg1: memref<16x32xf32, #tpu.memory_space<vmem>>, %arg2: memref<32x128xf32, #tpu.memory_space<vmem>>, %arg3: memref<1x128xf32, #tpu.memory_space<vmem>>, %arg4: memref<128x32xf32, #tpu.memory_space<vmem>>, %arg5: memref<1x32xf32, #tpu.memory_space<vmem>>, %arg6: memref<16x32xf32, #tpu.memory_space<vmem>>) attributes {dimension_semantics = [#tpu.dimension_semantics<parallel>], iteration_bounds = array<i64: 1>, scalar_prefetch = 0 : i64, scratch_operands = 0 : i64, tpu.core_type = #tpu.core_type<tc>, window_params = [{transform_indices = @transform_0, window_bounds = array<i64: 16, 32>}, {pipeline_mode = #tpu.pipeline_mode<synchronous>, transform_indices = @transform_1, window_bounds = array<i64: 32, 128>}, {pipeline_mode = #tpu.pipeline_mode<synchronous>, transform_indices = @transform_2, window_bounds = array<i64: 1, 128>}, {pipeline_mode = #tpu.pipeline_mode<synchronous>, transform_indices = @transform_3, window_bounds = array<i64: 128, 32>}, {pipeline_mode = #tpu.pipeline_mode<synchronous>, transform_indices = @transform_4, window_bounds = array<i64: 1, 32>}, {transform_indices = @transform_5, window_bounds = array<i64: 16, 32>}]} {
    %c0 = arith.constant 0 : index
    %c0_0 = arith.constant 0 : index
    %0 = vector.load %arg1[%c0, %c0_0] : memref<16x32xf32, #tpu.memory_space<vmem>>, vector<16x32xf32>
    %c0_1 = arith.constant 0 : index
    %c0_2 = arith.constant 0 : index
    %1 = vector.load %arg2[%c0_1, %c0_2] : memref<32x128xf32, #tpu.memory_space<vmem>>, vector<32x128xf32>
    %cst = arith.constant dense<0.000000e+00> : vector<16x128xf32>
    %2 = tpu.matmul %0, %1, %cst {dimension_numbers = #tpu.dot_dimension_numbers<[1], [0], [0], [1], [0, 0, 1, 1], [], []>} : vector<16x32xf32>, vector<32x128xf32>, vector<16x128xf32> -> vector<16x128xf32>
    %c0_3 = arith.constant 0 : index
    %c0_4 = arith.constant 0 : index
    %3 = vector.load %arg3[%c0_3, %c0_4] : memref<1x128xf32, #tpu.memory_space<vmem>>, vector<1x128xf32>
    %4 = vector.broadcast %3 : vector<1x128xf32> to vector<16x128xf32>
    %5 = arith.addf %2, %4 : vector<16x128xf32>
    %cst_5 = arith.constant 0.000000e+00 : f32
    %6 = vector.broadcast %cst_5 : f32 to vector<16x128xf32>
    %7 = arith.maximumf %5, %6 : vector<16x128xf32>
    %c0_6 = arith.constant 0 : index
    %c0_7 = arith.constant 0 : index
    %8 = vector.load %arg4[%c0_6, %c0_7] : memref<128x32xf32, #tpu.memory_space<vmem>>, vector<128x32xf32>
    %cst_8 = arith.constant dense<0.000000e+00> : vector<16x32xf32>
    %9 = tpu.matmul %7, %8, %cst_8 {dimension_numbers = #tpu.dot_dimension_numbers<[1], [0], [0], [1], [0, 0, 1, 1], [], []>} : vector<16x128xf32>, vector<128x32xf32>, vector<16x32xf32> -> vector<16x32xf32>
    %c0_9 = arith.constant 0 : index
    %c0_10 = arith.constant 0 : index
    %10 = vector.load %arg5[%c0_9, %c0_10] : memref<1x32xf32, #tpu.memory_space<vmem>>, vector<1x32xf32>
    %11 = vector.broadcast %10 : vector<1x32xf32> to vector<16x32xf32>
    %12 = arith.addf %9, %11 : vector<16x32xf32>
    %c0_11 = arith.constant 0 : index
    %c0_12 = arith.constant 0 : index
    %13 = vector.load %arg6[%c0_11, %c0_12] : memref<16x32xf32, #tpu.memory_space<vmem>>, vector<16x32xf32>
    tpu.vector_store %arg6[%c0_11, %c0_12], %12 {strides = array<i32>} : memref<16x32xf32, #tpu.memory_space<vmem>>, vector<16x32xf32>,
    return
  }
  func.func @transform_0(%arg0: i32) -> (i32, i32) {
    %c0_i32 = arith.constant 0 : i32
    %c0_i32_0 = arith.constant 0 : i32
    return %arg0, %c0_i32 : i32, i32
  }
  func.func @transform_1(%arg0: i32) -> (i32, i32) {
    %c0_i32 = arith.constant 0 : i32
    %c0_i32_0 = arith.constant 0 : i32
    %c0_i32_1 = arith.constant 0 : i32
    return %c0_i32, %c0_i32_0 : i32, i32
  }
  func.func @transform_2(%arg0: i32) -> (i32, i32) {
    %c0_i32 = arith.constant 0 : i32
    %c0_i32_0 = arith.constant 0 : i32
    %c0_i32_1 = arith.constant 0 : i32
    return %c0_i32, %c0_i32_0 : i32, i32
  }
  func.func @transform_3(%arg0: i32) -> (i32, i32) {
    %c0_i32 = arith.constant 0 : i32
    %c0_i32_0 = arith.constant 0 : i32
    %c0_i32_1 = arith.constant 0 : i32
    return %c0_i32, %c0_i32_0 : i32, i32
  }
  func.func @transform_4(%arg0: i32) -> (i32, i32) {
    %c0_i32 = arith.constant 0 : i32
    %c0_i32_0 = arith.constant 0 : i32
    %c0_i32_1 = arith.constant 0 : i32
    return %c0_i32, %c0_i32_0 : i32, i32
  }
  func.func @transform_5(%arg0: i32) -> (i32, i32) {
    %c0_i32 = arith.constant 0 : i32
    %c0_i32_0 = arith.constant 0 : i32
    return %arg0, %c0_i32 : i32, i32
  }
}

</mosaic_0001>

<bundles_post_ra>
// kernel: tpu_custom_call.1
= control target key start
LH: loop header
LB: loop body
LE: loop exit
PB: predicated region body
PF: predicated region fallthrough
CT: control target
= control target key end

     0   :  { %vm31_vm0 = vcmask 261120   ;;  %s287_s0 = inlined_call_operand.vmem [shape: f32[16,32], index: 0, kind: input, shape index: {}]   ;;  %s288_s1 = inlined_call_operand.vmem [shape: f32[32,128], index: 1, kind: input, shape index: {}]   ;;  %s289_s2 = inlined_call_operand.vmem [shape: f32[1,128], index: 2, kind: input, shape index: {}]   ;;  %s290_s3 = inlined_call_operand.vmem [shape: f32[128,32], index: 3, kind: input, shape index: {}]   ;;  %s291_s4 = inlined_call_operand.vmem [shape: f32[1,32], index: 4, kind: input, shape index: {}]   ;;  %s292_s5 = inlined_call_operand.hbm [shape: f32[16,32], index: 5, kind: output, shape index: {}]  }
   0x1   :  { %v26_v0 = vld [vmem:[%s288_s1 + $0x18] sm:$0xff]  ;;  %v25_v1 = vld [vmem:[%s288_s1 + $0x10] sm:$0xff]  ;;  %v24_v2 = vld [vmem:[%s288_s1 + $0x8] sm:$0xff] }
   0x2   :  { %50 = vmatpush.msra.mxu0 %v26_v0  ;;  %v78_v3 = vld [vmem:[%s290_s3 + $0x78] sm:$0xff]  ;;  %v77_v4 = vld [vmem:[%s290_s3 + $0x70] sm:$0xff]  ;;  %v23_v5 = vld [vmem:[%s288_s1] sm:$0xff] }
   0x3   :  { %83 = vmatpush.msra.mxu1 %v78_v3  ;;  %v76_v6 = vld [vmem:[%s290_s3 + $0x68] sm:$0xff]  ;;  %128 = vmatpush.msra.mxu2 %v78_v3  ;;  %v21_v7 = vld [vmem:[%s287_s0] sm:$0xff] }
   0x4   :  { %51 = vmatpush.msra.mxu0 %v25_v1  ;;  %v75_v8 = vld [vmem:[%s290_s3 + $0x60] sm:$0xff] }
   0x5   :  { %84 = vmatpush.msra.mxu1 %v77_v4  ;;  %129 = vmatpush.msra.mxu2 %v77_v4 }
   0x6   :  { %52 = vmatpush.msra.mxu0 %v24_v2 }
   0x7   :  { %85 = vmatpush.msra.mxu1 %v76_v6 }
   0x8   :  { %53 = vmatpush.msra.mxu0 %v23_v5 }
   0x9   :  { %10 = vsyncpa [#allocation3], 0  ;;  %126 = vmatmul.msk.f32.vlgmr.msra.gmra.mxu0 %vm31_vm0, %v21_v7  ;;  %v74_v9 = vld [vmem:[%s290_s3 + $0x58] sm:$0xff]  ;;  %130 = vmatpush.msra.mxu2 %v76_v6  ;;  %v73_v10 = vld [vmem:[%s290_s3 + $0x50] sm:$0xff]  ;;  %s114_s15 = sshll.u32 %s292_s5, 4  ;;  %s176_s16 = smov 128   ;;  %s115_s15 = int_to_ptr.hbm [resolvable:$true] %s114_s15 }
   0xa   :  { %86 = vmatpush.msra.mxu1 %v75_v8  ;;  %v72_v11 = vld [vmem:[%s290_s3 + $0x48] sm:$0xff]  ;;  %v71_v13 = vld [vmem:[%s290_s3 + $0x40] sm:$0xff]  ;;  %v70_v14 = vld [vmem:[%s290_s3 + $0x38] sm:$0xff]  ;;  %s177_s17 = smov 8  }
   0xb   :  { %131 = vmatpush.msra.mxu2 %v75_v8  ;;  %v22_v12 = vld [vmem:[%s287_s0 + $0x8] sm:$0xff]  ;;  %v69_v15 = vld [vmem:[%s290_s3 + $0x30] sm:$0xff]  ;;  %v67_v17 = vld [vmem:[%s290_s3 + $0x20] sm:$0xff] }
   0xc   :  { %87 = vmatpush.msra.mxu1 %v74_v9  ;;  %v68_v16 = vld [vmem:[%s290_s3 + $0x28] sm:$0xff]  ;;  %v66_v18 = vld [vmem:[%s290_s3 + $0x18] sm:$0xff]  ;;  %v65_v19 = vld [vmem:[%s290_s3 + $0x10] sm:$0xff] }
   0xd   :  { %132 = vmatpush.msra.mxu2 %v74_v9  ;;  %v64_v20 = vld [vmem:[%s290_s3 + $0x8] sm:$0xff]  ;;  %v63_v21 = vld [vmem:[%s290_s3] sm:$0xff]  ;;  %s175_s3 = smov [#allocation2]  }
   0xe   :  { %88 = vmatpush.msra.mxu1 %v73_v10  ;;  %v147_v22 = vld [vmem:[%s289_s2] ss:$0 sm:$0xff]  ;;  %s112_s13 = sshll.u32 %s175_s3, 4  ;;  %s113_s13 = int_to_ptr.vmem [resolvable:$true] %s112_s13 }
   0xf   :  { %133 = vmatpush.msra.mxu2 %v73_v10  ;;  %v148_v29 = vld [vmem:[%s291_s4] ss:$0 sm:$0xff] }
  0x10   :  { %89 = vmatpush.msra.mxu1 %v72_v11 }
  0x11   :  { %127 = vmatmul.msk.f32.gmra.mxu0 %vm31_vm0, %v22_v12  ;;  %134 = vmatpush.msra.mxu2 %v72_v11 }
  0x12   :  { %90 = vmatpush.msra.mxu1 %v71_v13 }
  0x13   :  { %135 = vmatpush.msra.mxu2 %v71_v13 }
  0x14   :  { %91 = vmatpush.msra.mxu1 %v70_v14 }
  0x15   :  { %136 = vmatpush.msra.mxu2 %v70_v14 }
  0x16   :  { %92 = vmatpush.msra.mxu1 %v69_v15 }
  0x17   :  { %137 = vmatpush.msra.mxu2 %v69_v15 }
  0x18   :  { %93 = vmatpush.msra.mxu1 %v68_v16 }
  0x19   :  { %138 = vmatpush.msra.mxu2 %v68_v16 }
  0x1a   :  { %94 = vmatpush.msra.mxu1 %v67_v17 }
  0x1b   :  { %139 = vmatpush.msra.mxu2 %v67_v17 }
  0x1c   :  { %95 = vmatpush.msra.mxu1 %v66_v18 }
  0x1d   :  { %140 = vmatpush.msra.mxu2 %v66_v18 }
  0x1e   :  { %96 = vmatpush.msra.mxu1 %v65_v19 }
  0x1f   :  { %141 = vmatpush.msra.mxu2 %v65_v19 }
  0x20   :  { %97 = vmatpush.msra.mxu1 %v64_v20 }
  0x21   :  { %142 = vmatpush.msra.mxu2 %v64_v20 }
  0x22   :  { %98 = vmatpush.msra.mxu1 %v63_v21 }
  0x23   :  { %143 = vmatpush.msra.mxu2 %v63_v21 }
  0x86   :  { %v55_v23 = vpop.f32.mrf.mxu0 }
  0x87   :  { %v56_v24 = vadd.f32 %v147_v22, %v55_v23 }
  0x89   :  { %v61_v25 = vmax.f32 %v56_v24, 0.0 }
  0x8b   :  { %99 = vmatmul.f32.vlgmr.msra.gmra.mxu1 %v61_v25 }
  0x8e   :  { %v58_v26 = vpop.f32.mrf.mxu0 }
  0x8f   :  { %v59_v27 = vadd.f32 %v147_v22, %v58_v26 }
  0x91   :  { %v62_v28 = vmax.f32 %v59_v27, 0.0 }
  0x93   :  { %102 = vmatmul.f32.vlgmr.msra.gmra.mxu2 %v62_v28 }
 0x108   :  { %v100_v30 = vpop.f32.mrf.mxu1 }
 0x109   :  { %v101_v31 = vadd.f32 %v148_v29, %v100_v30 }
 0x10b   :  { %106 = vst.msk [vmem:[#allocation2] sm:$0xff] %vm31_vm0, %v101_v31 }
 0x116   :  { %v103_v32 = vpop.f32.mrf.mxu2 }
 0x117   :  { %v104_v33 = vadd.f32 %v148_v29, %v103_v32 }
 0x119   :  { %107 = vst.msk [vmem:[#allocation2 + $0x8] sm:$0xff] %vm31_vm0, %v104_v33 }
 0x11a   :  { %120 = dma.vmem_to_hbm [thread:$0]  %s113_s13, 256, %s115_s15, [#allocation3], %s176_s16, %s176_s16, %s177_s17  }
 0x11b   :  { %173 = dma.done.wait [#allocation3], 256  }
 0x11c   :  { %174 = vsyncadd [#allocation3], 4294967040 }
 0x11d   :  { %125 = vsyncpa [#allocation3], 1 }

// kernel: tpu_custom_call.1
= control target key start
LH: loop header
LB: loop body
LE: loop exit
PB: predicated region body
PF: predicated region fallthrough
CT: control target
= control target key end

     0   :  { %vm31_vm0 = vcmask 261120   ;;  %s287_s0 = inlined_call_operand.vmem [shape: f32[16,32], index: 0, kind: input, shape index: {}]   ;;  %s288_s1 = inlined_call_operand.vmem [shape: f32[32,128], index: 1, kind: input, shape index: {}]   ;;  %s289_s2 = inlined_call_operand.vmem [shape: f32[1,128], index: 2, kind: input, shape index: {}]   ;;  %s290_s3 = inlined_call_operand.vmem [shape: f32[128,32], index: 3, kind: input, shape index: {}]   ;;  %s291_s4 = inlined_call_operand.vmem [shape: f32[1,32], index: 4, kind: input, shape index: {}]   ;;  %s292_s5 = inlined_call_operand.hbm [shape: f32[16,32], index: 5, kind: output, shape index: {}]  }
   0x1   :  { %v26_v0 = vld [vmem:[%s288_s1 + $0x18] sm:$0xff]  ;;  %v25_v1 = vld [vmem:[%s288_s1 + $0x10] sm:$0xff]  ;;  %v24_v2 = vld [vmem:[%s288_s1 + $0x8] sm:$0xff] }
   0x2   :  { %50 = vmatpush.msra.mxu0 %v26_v0  ;;  %v78_v3 = vld [vmem:[%s290_s3 + $0x78] sm:$0xff]  ;;  %v77_v4 = vld [vmem:[%s290_s3 + $0x70] sm:$0xff]  ;;  %v23_v5 = vld [vmem:[%s288_s1] sm:$0xff] }
   0x3   :  { %83 = vmatpush.msra.mxu1 %v78_v3  ;;  %v76_v6 = vld [vmem:[%s290_s3 + $0x68] sm:$0xff]  ;;  %128 = vmatpush.msra.mxu2 %v78_v3  ;;  %v21_v7 = vld [vmem:[%s287_s0] sm:$0xff] }
   0x4   :  { %51 = vmatpush.msra.mxu0 %v25_v1  ;;  %v75_v8 = vld [vmem:[%s290_s3 + $0x60] sm:$0xff] }
   0x5   :  { %84 = vmatpush.msra.mxu1 %v77_v4  ;;  %129 = vmatpush.msra.mxu2 %v77_v4 }
   0x6   :  { %52 = vmatpush.msra.mxu0 %v24_v2 }
   0x7   :  { %85 = vmatpush.msra.mxu1 %v76_v6 }
   0x8   :  { %53 = vmatpush.msra.mxu0 %v23_v5 }
   0x9   :  { %10 = vsyncpa [#allocation3], 0  ;;  %126 = vmatmul.msk.f32.vlgmr.msra.gmra.mxu0 %vm31_vm0, %v21_v7  ;;  %v74_v9 = vld [vmem:[%s290_s3 + $0x58] sm:$0xff]  ;;  %130 = vmatpush.msra.mxu2 %v76_v6  ;;  %v73_v10 = vld [vmem:[%s290_s3 + $0x50] sm:$0xff]  ;;  %s114_s15 = sshll.u32 %s292_s5, 4  ;;  %s176_s16 = smov 128   ;;  %s115_s15 = int_to_ptr.hbm [resolvable:$true] %s114_s15 }
   0xa   :  { %86 = vmatpush.msra.mxu1 %v75_v8  ;;  %v72_v11 = vld [vmem:[%s290_s3 + $0x48] sm:$0xff]  ;;  %v71_v13 = vld [vmem:[%s290_s3 + $0x40] sm:$0xff]  ;;  %v70_v14 = vld [vmem:[%s290_s3 + $0x38] sm:$0xff]  ;;  %s177_s17 = smov 8  }
   0xb   :  { %131 = vmatpush.msra.mxu2 %v75_v8  ;;  %v22_v12 = vld [vmem:[%s287_s0 + $0x8] sm:$0xff]  ;;  %v69_v15 = vld [vmem:[%s290_s3 + $0x30] sm:$0xff]  ;;  %v67_v17 = vld [vmem:[%s290_s3 + $0x20] sm:$0xff] }
   0xc   :  { %87 = vmatpush.msra.mxu1 %v74_v9  ;;  %v68_v16 = vld [vmem:[%s290_s3 + $0x28] sm:$0xff]  ;;  %v66_v18 = vld [vmem:[%s290_s3 + $0x18] sm:$0xff]  ;;  %v65_v19 = vld [vmem:[%s290_s3 + $0x10] sm:$0xff] }
   0xd   :  { %132 = vmatpush.msra.mxu2 %v74_v9  ;;  %v64_v20 = vld [vmem:[%s290_s3 + $0x8] sm:$0xff]  ;;  %v63_v21 = vld [vmem:[%s290_s3] sm:$0xff]  ;;  %s175_s3 = smov [#allocation2]  }
   0xe   :  { %88 = vmatpush.msra.mxu1 %v73_v10  ;;  %v147_v22 = vld [vmem:[%s289_s2] ss:$0 sm:$0xff]  ;;  %s112_s13 = sshll.u32 %s175_s3, 4  ;;  %s113_s13 = int_to_ptr.vmem [resolvable:$true] %s112_s13 }
   0xf   :  { %133 = vmatpush.msra.mxu2 %v73_v10  ;;  %v148_v29 = vld [vmem:[%s291_s4] ss:$0 sm:$0xff] }
  0x10   :  { %89 = vmatpush.msra.mxu1 %v72_v11 }
  0x11   :  { %127 = vmatmul.msk.f32.gmra.mxu0 %vm31_vm0, %v22_v12  ;;  %134 = vmatpush.msra.mxu2 %v72_v11 }
  0x12   :  { %90 = vmatpush.msra.mxu1 %v71_v13 }
  0x13   :  { %135 = vmatpush.msra.mxu2 %v71_v13 }
  0x14   :  { %91 = vmatpush.msra.mxu1 %v70_v14 }
  0x15   :  { %136 = vmatpush.msra.mxu2 %v70_v14 }
  0x16   :  { %92 = vmatpush.msra.mxu1 %v69_v15 }
  0x17   :  { %137 = vmatpush.msra.mxu2 %v69_v15 }
  0x18   :  { %93 = vmatpush.msra.mxu1 %v68_v16 }
  0x19   :  { %138 = vmatpush.msra.mxu2 %v68_v16 }
  0x1a   :  { %94 = vmatpush.msra.mxu1 %v67_v17 }
  0x1b   :  { %139 = vmatpush.msra.mxu2 %v67_v17 }
  0x1c   :  { %95 = vmatpush.msra.mxu1 %v66_v18 }
  0x1d   :  { %140 = vmatpush.msra.mxu2 %v66_v18 }
  0x1e   :  { %96 = vmatpush.msra.mxu1 %v65_v19 }
  0x1f   :  { %141 = vmatpush.msra.mxu2 %v65_v19 }
  0x20   :  { %97 = vmatpush.msra.mxu1 %v64_v20 }
  0x21   :  { %142 = vmatpush.msra.mxu2 %v64_v20 }
  0x22   :  { %98 = vmatpush.msra.mxu1 %v63_v21 }
  0x23   :  { %143 = vmatpush.msra.mxu2 %v63_v21 }
  0x86   :  { %v55_v23 = vpop.f32.mrf.mxu0 }
  0x87   :  { %v56_v24 = vadd.f32 %v147_v22, %v55_v23 }
  0x89   :  { %v61_v25 = vmax.f32 %v56_v24, 0.0 }
  0x8b   :  { %99 = vmatmul.f32.vlgmr.msra.gmra.mxu1 %v61_v25 }
  0x8e   :  { %v58_v26 = vpop.f32.mrf.mxu0 }
  0x8f   :  { %v59_v27 = vadd.f32 %v147_v22, %v58_v26 }
  0x91   :  { %v62_v28 = vmax.f32 %v59_v27, 0.0 }
  0x93   :  { %102 = vmatmul.f32.vlgmr.msra.gmra.mxu2 %v62_v28 }
 0x108   :  { %v100_v30 = vpop.f32.mrf.mxu1 }
 0x109   :  { %v101_v31 = vadd.f32 %v148_v29, %v100_v30 }
 0x10b   :  { %106 = vst.msk [vmem:[#allocation2] sm:$0xff] %vm31_vm0, %v101_v31 }
 0x116   :  { %v103_v32 = vpop.f32.mrf.mxu2 }
 0x117   :  { %v104_v33 = vadd.f32 %v148_v29, %v103_v32 }
 0x119   :  { %107 = vst.msk [vmem:[#allocation2 + $0x8] sm:$0xff] %vm31_vm0, %v104_v33 }
 0x11a   :  { %120 = dma.vmem_to_hbm [thread:$0]  %s113_s13, 256, %s115_s15, [#allocation3], %s176_s16, %s176_s16, %s177_s17  }
 0x11b   :  { %173 = dma.done.wait [#allocation3], 256  }
 0x11c   :  { %174 = vsyncadd [#allocation3], 4294967040 }
 0x11d   :  { %125 = vsyncpa [#allocation3], 1 }

</bundles_post_ra>
